<compile_context>
chip_gen: v7x
topology: tpu7x:2x2x1
jax: 0.10.0
libtpu: 0.0.40
codegen_flags: <defaults>
</compile_context>

<pallas_src>
import jax
import jax.numpy as jnp
from jax.experimental import pallas as pl
from jax.experimental.pallas import tpu as pltpu


def _prefers_native_bf16():
    """bf16 VPU/EUP exist on v6e/v7x; keep f32 compute elsewhere (v5e/v4/...)."""
    try:
        kind = jax.devices()[0].device_kind.lower()
    except Exception:
        return False
    return ("v6" in kind) or ("v7" in kind)


def _make_kernel(compute_dtype):
    def kernel(x_ref, alpha_ref, beta_ref, o_ref):
        # x_ref:     (tb, tn) tile of input
        # alpha_ref: (1, tn)  row block, broadcast over sublanes
        # beta_ref:  (1, tn)  row block, broadcast over sublanes
        x = x_ref[...].astype(compute_dtype)
        a = alpha_ref[...].astype(compute_dtype)
        b = beta_ref[...].astype(compute_dtype)
        z = x * b                              # VPU
        silu = z * jax.nn.sigmoid(z)           # sigmoid -> EUP slot (free-ish)
        o_ref[...] = (a * silu).astype(o_ref.dtype)
    return kernel


def relu_like(x, alpha, beta, *, max_block_bytes=4 * 1024 * 1024,
              force_pallas=False):
    """alpha * SiLU(x * beta), matching PyTorch Relu_like.forward.

    x: (B, N); alpha, beta: (1, N).
    Blocks are (tb, tn): tn == N when that fits the byte budget (lane-dense,
    unmasked vst), otherwise a multiple of 128; tb is a multiple of 8 sized
    from the budget and clamped so the batch axis has >=2 grid steps when B
    can be split (keeps both v7x TensorCores streaming).
    """
    B, N = x.shape
    assert alpha.shape == (1, N) and beta.shape == (1, N)

    itemsize = jnp.dtype(x.dtype).itemsize
    total_bytes = B * N * itemsize

    # Tiny-input fast path: a fused XLA elementwise beats the pallas_call
    # launch/pipeline setup for a few-hundred-KiB problem.
    if not force_pallas and total_bytes < 256 * 1024:
        z = x.astype(jnp.float32) * beta.astype(jnp.float32)
        return (alpha.astype(jnp.float32) * (z * jax.nn.sigmoid(z))).astype(x.dtype)

    # --- feature-dim tiling (only if a single (8, N) slab would blow the budget)
    if N * itemsize * 8 <= max_block_bytes:
        tn = N                                    # full width: unmasked vst
    else:
        tn = max(128, (max_block_bytes // (8 * itemsize)) // 128 * 128)
        tn = min(tn, ((N + 127) // 128) * 128)    # lane-dense multiple of 128

    # --- batch-dim tiling
    if B <= 8:
        tb = B                                    # full-dim block (tiny batch)
    else:
        rows_budget = max(8, (max_block_bytes // max(1, tn * itemsize)) // 8 * 8)
        # v7x has 2 TCs: make sure the parallel batch axis has >=2 steps when B
        # is splittable (no-op cost on 1-TC chips).
        half = ((pl.cdiv(B, 2) + 7) // 8) * 8
        rows_budget = min(rows_budget, half)
        tb = min(rows_budget, ((B + 7) // 8) * 8)

    grid = (pl.cdiv(B, tb), pl.cdiv(N, tn))

    if x.dtype == jnp.bfloat16 and _prefers_native_bf16():
        compute_dtype = jnp.bfloat16              # native bf16 VPU/EUP on v6e/v7x
    else:
        compute_dtype = jnp.float32               # v5e (no bf16 VPU/EUP) / f32 in

    cost = pl.CostEstimate(
        flops=4 * B * N,
        transcendentals=B * N,
        bytes_accessed=2 * B * N * itemsize + 2 * N * jnp.dtype(alpha.dtype).itemsize,
    )

    return pl.pallas_call(
        _make_kernel(compute_dtype),
        out_shape=jax.ShapeDtypeStruct((B, N), x.dtype),
        grid=grid,
        in_specs=[
            pl.BlockSpec((tb, tn), lambda i, j: (i, j)),   # x: streamed, lane-dense
            pl.BlockSpec((1, tn), lambda i, j: (0, j)),    # alpha: resident across batch
            pl.BlockSpec((1, tn), lambda i, j: (0, j)),    # beta:  resident across batch
        ],
        out_specs=pl.BlockSpec((tb, tn), lambda i, j: (i, j)),
        compiler_params=pltpu.CompilerParams(
            dimension_semantics=("parallel", "parallel"),  # shards across TCs on v7x
            vmem_limit_bytes=32 * 1024 * 1024,
        ),
        cost_estimate=cost,
    )(x, alpha, beta)


if __name__ == "__main__":
    # Module hyperparameters (synthetic, deterministic):
    neuron1 = 64      # only scales beta's init (beta = 1/neuron1)
    neuron = 128      # feature dimension
    batch = 16

    # Deterministic parameter init mirroring nn.Module.__init__:
    #   alpha = ones(1, neuron); beta = ones(1, neuron) / neuron1
    alpha = jnp.ones((1, neuron), dtype=jnp.float32)
    beta = jnp.ones((1, neuron), dtype=jnp.float32) / float(neuron1)

    key = jax.random.PRNGKey(0)
    x = jax.random.normal(key, (batch, neuron), dtype=jnp.float32)

    # Reference (pure-JAX mirror of the PyTorch forward).
    def ref_fn(xv):
        z = xv * beta
        return alpha * (z * jax.nn.sigmoid(z))

    # 1) Pallas path (forced, since this demo input is tiny): 2-step batch grid.
    out = jax.block_until_ready(relu_like(x, alpha, beta, force_pallas=True))
    assert out.shape == (batch, neuron)
    assert jnp.allclose(out, ref_fn(x), atol=1e-5, rtol=1e-5)

    # 2) Small-input fast path (fused XLA elementwise).
    out_fast = jax.block_until_ready(relu_like(x, alpha, beta))
    assert jnp.allclose(out_fast, ref_fn(x), atol=1e-5, rtol=1e-5)

    # 3) Ragged last block: B=50 with tb=16 -> grid of 4, masked final store.
    x2 = jax.random.normal(jax.random.PRNGKey(1), (50, neuron), dtype=jnp.float32)
    out2 = jax.block_until_ready(
        relu_like(x2, alpha, beta, force_pallas=True, max_block_bytes=8 * 1024))
    assert jnp.allclose(out2, ref_fn(x2), atol=1e-5, rtol=1e-5)

    print("KERNEL_OK")
</pallas_src>

<mosaic_0001>
module attributes {stable_mosaic.version = 11 : i64} {
  func.func @kernel(%arg0: i32, %arg1: i32, %arg2: memref<8x128xf32, #tpu.memory_space<vmem>>, %arg3: memref<1x128xf32, #tpu.memory_space<vmem>>, %arg4: memref<1x128xf32, #tpu.memory_space<vmem>>, %arg5: memref<8x128xf32, #tpu.memory_space<vmem>>) attributes {dimension_semantics = [#tpu.dimension_semantics<parallel>, #tpu.dimension_semantics<parallel>], iteration_bounds = array<i64: 2, 1>, scalar_prefetch = 0 : i64, scratch_operands = 0 : i64, tpu.core_type = #tpu.core_type<tc>, window_params = [{transform_indices = @transform_0, window_bounds = array<i64: 8, 128>}, {transform_indices = @transform_1, window_bounds = array<i64: 1, 128>}, {transform_indices = @transform_2, window_bounds = array<i64: 1, 128>}, {transform_indices = @transform_3, window_bounds = array<i64: 8, 128>}]} {
    %c0 = arith.constant 0 : index
    %c0_0 = arith.constant 0 : index
    %0 = vector.load %arg2[%c0, %c0_0] : memref<8x128xf32, #tpu.memory_space<vmem>>, vector<8x128xf32>
    %c0_1 = arith.constant 0 : index
    %c0_2 = arith.constant 0 : index
    %1 = vector.load %arg3[%c0_1, %c0_2] : memref<1x128xf32, #tpu.memory_space<vmem>>, vector<1x128xf32>
    %c0_3 = arith.constant 0 : index
    %c0_4 = arith.constant 0 : index
    %2 = vector.load %arg4[%c0_3, %c0_4] : memref<1x128xf32, #tpu.memory_space<vmem>>, vector<1x128xf32>
    %3 = vector.broadcast %2 : vector<1x128xf32> to vector<8x128xf32>
    %4 = arith.mulf %0, %3 : vector<8x128xf32>
    %5 = arith.negf %4 : vector<8x128xf32>
    %6 = math.exp %5 : vector<8x128xf32>
    %cst = arith.constant 1.000000e+00 : f32
    %7 = vector.broadcast %cst : f32 to vector<8x128xf32>
    %8 = arith.addf %7, %6 : vector<8x128xf32>
    %9 = arith.divf %7, %8 : vector<8x128xf32>
    %10 = arith.mulf %4, %9 : vector<8x128xf32>
    %11 = vector.broadcast %1 : vector<1x128xf32> to vector<8x128xf32>
    %12 = arith.mulf %11, %10 : vector<8x128xf32>
    %c0_5 = arith.constant 0 : index
    %c0_6 = arith.constant 0 : index
    %13 = vector.load %arg5[%c0_5, %c0_6] : memref<8x128xf32, #tpu.memory_space<vmem>>, vector<8x128xf32>
    tpu.vector_store %arg5[%c0_5, %c0_6], %12 {strides = array<i32>} : memref<8x128xf32, #tpu.memory_space<vmem>>, vector<8x128xf32>,
    return
  }
  func.func @transform_0(%arg0: i32, %arg1: i32) -> (i32, i32) {
    %c0_i32 = arith.constant 0 : i32
    return %arg0, %arg1 : i32, i32
  }
  func.func @transform_1(%arg0: i32, %arg1: i32) -> (i32, i32) {
    %c0_i32 = arith.constant 0 : i32
    %c0_i32_0 = arith.constant 0 : i32
    return %c0_i32, %arg1 : i32, i32
  }
  func.func @transform_2(%arg0: i32, %arg1: i32) -> (i32, i32) {
    %c0_i32 = arith.constant 0 : i32
    %c0_i32_0 = arith.constant 0 : i32
    return %c0_i32, %arg1 : i32, i32
  }
  func.func @transform_3(%arg0: i32, %arg1: i32) -> (i32, i32) {
    %c0_i32 = arith.constant 0 : i32
    return %arg0, %arg1 : i32, i32
  }
}

</mosaic_0001>

<bundles_post_ra>
// kernel: tpu_custom_call.1
= control target key start
LH: loop header
LB: loop body
LE: loop exit
PB: predicated region body
PF: predicated region fallthrough
CT: control target
= control target key end

     0   :  { %8 = vsyncpa [#allocation3], 0  ;;  %s773_s0 = inlined_call_operand.hbm [shape: f32[16,128], index: 0, kind: input, shape index: {}]   ;;  %s774_s1 = inlined_call_operand.vmem [shape: f32[1,128], index: 1, kind: input, shape index: {}]   ;;  %s775_s2 = inlined_call_operand.vmem [shape: f32[1,128], index: 2, kind: input, shape index: {}]   ;;  %s776_s3 = inlined_call_operand.hbm [shape: f32[16,128], index: 3, kind: output, shape index: {}]  }
   0x1   :  { %10 = vsyncpa [#allocation3 + $0x1], 0 }
   0x2   :  { %11 = vsyncpa [#allocation4], 0 }
   0x3   :  { %13 = vsyncpa [#allocation4 + $0x1], 0  ;;  %s595_s12 = smov 0   ;;  %s597_s13 = smov 0  }
   0x4   :  { %s599_s14 = smov 0   ;;  %s601_s15 = smov 0  }
   0x5   :  { %s603_s16 = smov 0   ;;  %s605_s17 = smov 0  }
   0x6 LB: > { %s375_s18 = sadd.s32 4294967295, %s571_s17   ;;  %s376_s19 = sadd.s32 4294967294, %s571_s17   ;;  %s571_s17 = sphi %s605_s17, %s19_s17   ;;  %s567_s16 = sphi %s603_s16, %s792_s16   ;;  %s563_s15 = sphi %s601_s15, %s791_s15   ;;  %s559_s14 = sphi %s599_s14, %s790_s14   ;;  %s555_s13 = sphi %s597_s13, %s789_s13   ;;  %s551_s12 = sphi %s595_s12, %s788_s12  }
   0x7   : > { %s31_s20 = sadd.s32 1, %s567_s16  ;;  %s40_s21 = sadd.s32 1, %s559_s14 }
   0x8   : > { %p33_p0 = scmp.ge.s32.totalorder %s31_s20, 2  ;;  %p47_p1 = scmp.ne.s32.totalorder %s559_s14, %s555_s13 }
   0x9   : > { %p48_p2 = scmp.eq.s32.totalorder %s571_s17, 0  ;;  %p53_p3 = scmp.ne.s32.totalorder %s555_s13, %s551_s12 }
   0xa   : > { %s794_s20 = smov (%p33_p0, %s31_s20), 0  ;;  %p54_p5 = scmp.eq.s32.totalorder %s375_s18, 0 }
   0xb   : > { %p636_p4 = por %p48_p2, %p47_p1  ;;  %s35_s23 = ssub.s32 %s567_s16, %s794_s20 }
   0xc   : > { %p131_p6 = scmp.eq.s32.totalorder %s375_s18, 1  ;;  %p38_p7 = scmp.eq.s32.totalorder %s35_s23, 0 }
   0xd   : > { %p642_p8 = por %p54_p5, %p53_p3  ;;  %p137_p10 = scmp.eq.s32.totalorder %s376_s19, 1 }
   0xe   : > { %p646_p9 = por %p131_p6, %p47_p1  ;;  %p405_p13 = scmp.lt.s32.totalorder %s571_s17, 2 }
   0xf   : > { %s651_s26 = scalar_select %p38_p7, %s559_s14, %s40_s21  }
  0x10   : > { %s780_s25 = scalar_select %p646_p9, 1, 0 }
  0x11   : > { %p653_p11 = por %p137_p10, %p53_p3  ;;  %s169_s28 = sand.u32 1, %s559_s14  }
  0x12   : > { %s381_s29 = sshll.u32 %s169_s28, 3  ;;  %s382_s30 = sshll.u32 %s567_s16, 7 }
  0x13   : > { %s781_s27 = scalar_select %p653_p11, 1, 0 }
  0x14   : > { %s664_s6 = scalar_lea.hbm %s773_s0, %s382_s30  ;;  %s173_s7 = scalar_lea.vmem [#allocation2], %s381_s29 }
  0x15   : > { %s181_s8 = sshll.u32 %s173_s7, 4  ;;  %p670_p0 = pnand %p405_p13, %p636_p4  ;;  %s666_s8 = int_to_ptr.vmem [resolvable:$true] %s181_s8 }
  0x16   : > { %s170_s10 = scalar_lea.sflag [#allocation3], %s169_s28  ;;  %s459_s11 = scalar_lea.hbm %s664_s6, 128 }
  0x17   : > { %p460_p3 = scmp.ne.s32.totalorder %s664_s6, %s459_s11  ;;  %p461_p5 = pneg %p670_p0 }
  0x18   : > { %s464_s21 = scalar_lea.hbm %s773_s0, 256  ;;  %p465_p4 = scmp.lt.u32.totalorder %s664_s6, %s773_s0 }
  0x19   : > { %p462_p6 = pnand %p461_p5, %p460_p3  ;;  %p466_p10 = scmp.lt.u32.totalorder %s464_s21, %s459_s11 }
  0x1a   : > { %p468_p12 = scmp.lt.u32.totalorder %s459_s11, %s664_s6 }
  0x1b   : > { %p463_p7 = pneg %p462_p6  ;;  %p467_p13 = por %p466_p10, %p465_p4 }
  0x1d   : > { %p469_p1 = por %p468_p12, %p467_p13 }
  0x1f   : > { %p470_p2 = pnand %p469_p1, %p463_p7 }
  0x21   : > { %473 = shalt.err (!%p470_p2)
}
  0x22   : > { %s474_s28 = scalar_lea.vmem %s666_s8, 128  ;;  %s573_s29 = smov [#allocation2]  }
  0x23   : > { %p475_p3 = scmp.ne.s32.totalorder %s666_s8, %s474_s28  ;;  %s479_s30 = sshll.u32 %s573_s29, 4  ;;  %s480_s30 = int_to_ptr.vmem [resolvable:$false] %s479_s30 }
  0x24   : > { %s481_s4 = scalar_lea.vmem %s480_s30, 256  ;;  %p482_p9 = scmp.lt.s32.totalorder %s666_s8, %s480_s30 }
  0x25   : > { %p477_p6 = pnand %p475_p3, %p461_p5  ;;  %p483_p4 = scmp.lt.s32.totalorder %s481_s4, %s474_s28 }
  0x27   : > { %p478_p11 = pneg %p477_p6  ;;  %p484_p10 = por %p483_p4, %p482_p9 }
  0x29   : > { %p485_p12 = pnand %p484_p10, %p478_p11 }
  0x2b   : > { %488 = shalt.err (!%p485_p12)
}
  0x2c   : > { %400 = dma.hbm_to_vmem [thread:$0]  (!%p670_p0), %s664_s6, 128, %s666_s8, %s170_s10  }
  0x2d   : > { %p783_p1 = scmp.lt.s32.totalorder %s571_s17, 3  ;;  %p784_p2 = scmp.ge.s32.totalorder %s571_s17, 1 }
  0x2f   : > { %p187_p5 = pnand %p784_p2, %p783_p1 }
  0x30   : > { %s706_s5 = sand.u32 (!%p187_p5), 1, %s555_s13  }
  0x31   : > { %190 = sbr.rel (%p187_p5) target bundleno = 105 (0x69), region = 32  ;;  %s384_s7 = sshll.u32 (!%p187_p5), %s706_s5, 3 }
  0x32   : > { %s193_s11 = scalar_lea.sflag (!%p187_p5), [#allocation3], %s706_s5  ;;  %s196_s18 = scalar_lea.vmem (!%p187_p5), [#allocation2], %s384_s7 }
  0x38   : > { %542 = dma.done.wait (%p642_p8), %s193_s11, 128  }
  0x39   : > { %544 = vsyncadd (%p642_p8), %s193_s11, 4294967168  ;;  %v231_v0 = vld [vmem:[%s196_s18] sm:$0xff]  ;;  %s224_s24 = scalar_lea.vmem [#allocation5], %s384_s7  ;;  %s390_s21 = sshll.u32 %s563_s15, 7 }
  0x3a   : > { %v386_v1 = vld [vmem:[%s775_s2] ss:$0 sm:$0xff]  ;;  %s271_s19 = sshll.u32 %s224_s24, 4  ;;  %s726_s28 = scalar_lea.hbm %s776_s3, %s390_s21  ;;  %s721_s19 = int_to_ptr.vmem [resolvable:$true] %s271_s19 }
  0x3b   : > { %v240_v2 = vmul.f32 %v386_v1, %v231_v0  ;;  %v388_v7 = vld [vmem:[%s774_s1] ss:$0 sm:$0xff]  ;;  %s257_s29 = scalar_lea.sflag [#allocation4], %s706_s5  ;;  %s489_s30 = scalar_lea.vmem %s721_s19, 128 }
  0x3c   : > { %p490_p8 = scmp.ne.s32.totalorder %s721_s19, %s489_s30  ;;  %p785_p9 = scmp.ne.s32.totalorder %s780_s25, 0 }
  0x3d   : > { %v387_v3 = vmul.f32 -1.442695, %v240_v2  ;;  %s574_s15 = smov [#allocation5]  }
  0x3e   : > { %p491_p11 = pnand %p490_p8, %p785_p9  ;;  %s493_s4 = sshll.u32 %s574_s15, 4  ;;  %s494_s4 = int_to_ptr.vmem [resolvable:$false] %s493_s4 }
  0x3f   : > { %455 = vpow2.f32 %v387_v3  ;;  %s495_s7 = scalar_lea.vmem %s494_s4, 256  ;;  %p496_p7 = scmp.lt.s32.totalorder %s721_s19, %s494_s4 }
  0x40   : > { %p492_p0 = pneg %p491_p11  ;;  %p497_p13 = scmp.lt.s32.totalorder %s495_s7, %s489_s30 }
  0x42   : > { %p498_p3 = por %p497_p13, %p496_p7 }
  0x44   : > { %p499_p6 = pnand %p498_p3, %p492_p0 }
  0x49   : > { %v456_v4 = vpop.eup %455 }
  0x4a   : > { %v244_v5 = vadd.f32 1.0, %v456_v4 }
  0x4c   : > { %457 = vrcp.f32 %v244_v5 }
  0x56   : > { %v458_v6 = vpop.eup %457 }
  0x57   : > { %v247_v8 = vmul.f32 %v458_v6, %v240_v2 }
  0x59   : > { %v254_v9 = vmul.f32 %v388_v7, %v247_v8 }
  0x5b   : > { %255 = vst [vmem:[%s224_s24] sm:$0xff] %v254_v9 }
  0x5c   : > { %502 = shalt.err (!%p499_p6)
}
  0x5d   : > { %s503_s5 = scalar_lea.hbm %s726_s28, 128  ;;  %s507_s6 = scalar_lea.hbm %s776_s3, 256 }
  0x5e   : > { %p504_p4 = scmp.ne.s32.totalorder %s726_s28, %s503_s5  ;;  %p508_p1 = scmp.lt.u32.totalorder %s726_s28, %s776_s3 }
  0x5f   : > { %p509_p2 = scmp.lt.u32.totalorder %s507_s6, %s503_s5  ;;  %p511_p8 = scmp.lt.u32.totalorder %s503_s5, %s726_s28 }
  0x60   : > { %p505_p10 = pnand %p504_p4, %p785_p9 }
  0x61   : > { %p510_p5 = por %p509_p2, %p508_p1 }
  0x62   : > { %p506_p12 = pneg %p505_p10 }
  0x63   : > { %p512_p11 = por %p511_p8, %p510_p5 }
  0x65   : > { %p513_p0 = pnand %p512_p11, %p506_p12 }
  0x67   : > { %516 = shalt.err (!%p513_p0)
}
  0x68   : > { %395 = dma.vmem_to_hbm [thread:$0]  (%p785_p9), %s721_s19, 128, %s726_s28, %s257_s29  }
  0x69 PF: > { %s283_s10 = sand.u32 1, %s551_s12   ;;  %p786_p7 = scmp.ne.s32.totalorder %s781_s27, 0 }
  0x6a   : > { %p787_p13 = scmp.ge.s32.totalorder %s571_s17, 2  ;;  %s284_s24 = scalar_lea.sflag [#allocation4], %s283_s10 }
  0x6c   : > { %p402_p3 = pnand %p787_p13, %p786_p7 }
  0x6e   : > { %546 = dma.done.wait (!%p402_p3), %s284_s24, 128  }
  0x6f   : > { %548 = vsyncadd (!%p402_p3), %s284_s24, 4294967168  ;;  %s19_s17 = sadd.s32 1, %s571_s17   ;;  %s788_s12 = smov %s555_s13 }
  0x70   : > { %p16_p6 = scmp.ge.s32.totalorder %s19_s17, 4   ;;  %s789_s13 = smov %s559_s14 }
  0x71   : > { %s790_s14 = smov %s651_s26  ;;  %s791_s15 = smov %s567_s16 }
  0x72   : > { %s792_s16 = smov %s794_s20  ;;  %18 = sbr.rel (!%p16_p6) target bundleno = 6 (0x6), region = 83 }
  0x79   :  { %289 = vsyncpa [#allocation3], 1 }
  0x7a   :  { %291 = vsyncpa [#allocation3 + $0x1], 1 }
  0x7b   :  { %292 = vsyncpa [#allocation4], 1 }
  0x7c   :  { %294 = vsyncpa [#allocation4 + $0x1], 1 }

</bundles_post_ra>
